<compile_context>
chip_gen: v6e
topology: v6e:2x2x1
jax: 0.10.0
libtpu: 0.0.40
codegen_flags: <defaults>
</compile_context>

<pallas_src>
import functools

import jax
import jax.numpy as jnp
from jax import lax
from jax.experimental import pallas as pl
from jax.experimental.pallas import tpu as pltpu

_MB = 1024 * 1024


# ----------------------------------------------------------------------------
# Kernel
# ----------------------------------------------------------------------------
def _layernorm_kernel(x_ref, gamma_ref, beta_ref, o_ref, *, eps, inv_s):
    # x_ref:     (BB, S, TH)   -- reduction over S (dim=-2)
    # gamma_ref: (1, TH)
    # beta_ref:  (1, TH)
    x = x_ref[...].astype(jnp.float32)                       # (BB, S, TH)

    mean = jnp.sum(x, axis=-2, keepdims=True) * inv_s        # (BB, 1, TH)
    xc = x - mean
    var = jnp.sum(xc * xc, axis=-2, keepdims=True) * inv_s   # two-pass (matches torch)
    rstd = lax.rsqrt(var + eps)                              # EUP slot

    gamma = gamma_ref[...].astype(jnp.float32)[None]         # (1, 1, TH)
    beta = beta_ref[...].astype(jnp.float32)[None]           # (1, 1, TH)

    # y = xc * rstd ; out = gamma*y + beta  == xc * (gamma*rstd) + beta
    o_ref[...] = (xc * (gamma * rstd) + beta).astype(o_ref.dtype)


# ----------------------------------------------------------------------------
# VMEM budgeting (generation-aware)
# ----------------------------------------------------------------------------
def _vmem_capacity_bytes():
    try:
        info = pltpu.get_tpu_info()
        cap = getattr(info, "vmem_capacity_bytes", None)
        if cap:
            return int(cap)
    except Exception:
        pass
    return 128 * _MB  # v5e / v6e default


def _vmem_budgets():
    cap = _vmem_capacity_bytes()
    if cap <= 64 * _MB:
        base_limit = 48 * _MB          # v7x-class: 64 MiB physical per TC
    else:
        base_limit = 64 * _MB          # v5e / v6e: 128 MiB physical
    block_budget = int(base_limit * 0.8)
    return cap, base_limit, block_budget


def _choose_tiles(B, S, Hp, x_itemsize, block_budget):
    """Pick (BB, TH, estimated_block_vmem_bytes).

    VMEM cost model per block element:
      2x double-buffered input (x_itemsize) + 2x double-buffered output
      (x_itemsize) + ~3 f32 temporaries (f32 copy, centered copy, pre-store).
    """
    vmem_per_elem = 4 * x_itemsize + 12
    hbm_per_elem = 2 * x_itemsize      # read + write

    if Hp % 128 == 0:
        n = Hp // 128
        th_cands = [128 * d for d in range(1, n + 1) if n % d == 0]
    else:
        th_cands = [Hp]                # full extent (Hp < 128 or unpadded small H)
    bb_cands = [d for d in range(1, B + 1) if B % d == 0]

    total_traffic = B * S * Hp * hbm_per_elem
    if total_traffic >= 32 * _MB:
        min_steps = 8                  # enough steps to keep the pipeline busy
    elif total_traffic >= 2 * _MB:
        min_steps = 2                  # at least feed both TensorCores (megacore)
    else:
        min_steps = 1

    best_key, best = None, None
    fb_vmem, fb = None, None
    for th in th_cands:
        for bb in bb_cands:
            elems = bb * S * th
            vmem = elems * vmem_per_elem
            if fb_vmem is None or vmem < fb_vmem:
                fb_vmem, fb = vmem, (bb, th)
            if vmem > block_budget:
                continue
            steps = (B // bb) * (Hp // th)
            # Prefer reaching min_steps; among those, maximize per-step traffic.
            key = (min(steps, min_steps), elems * hbm_per_elem)
            if best_key is None or key > best_key:
                best_key, best = key, (bb, th)

    if best is not None:
        bb, th = best
        return bb, th, bb * S * th * vmem_per_elem

    # Nothing fits the budget: fall back to the smallest legal block and let the
    # wrapper raise vmem_limit_bytes toward the physical capacity.
    # TODO(synk): huge-S with tiny / lane-unaligned H needs an S-chunked
    # two-phase kernel (accumulate sums, then re-read x); not implemented.
    bb, th = fb
    return bb, th, fb_vmem


# ----------------------------------------------------------------------------
# Wrapper
# ----------------------------------------------------------------------------
def layer_normalization(x, gamma, beta, eps=1e-5, *, _block_budget_bytes=None):
    """x: (B, S, H); gamma, beta: (H,).  Returns array of shape (B, S, H)."""
    B, S, H = x.shape
    cap, base_limit, block_budget = _vmem_budgets()
    if _block_budget_bytes is not None:
        block_budget = int(_block_budget_bytes)

    xb = x.dtype.itemsize
    vmem_per_elem = 4 * xb + 12

    # If H is not lane-aligned and the only legal block (full H) would bust the
    # VMEM budget, pad H up to a multiple of 128 so the hidden axis can be
    # tiled.  Padded columns are computed on zeros (finite: var+eps>0) and
    # sliced off afterwards; gamma/beta pad with zeros.
    Hp = H
    if H % 128 != 0 and S * H * vmem_per_elem > block_budget:
        Hp = ((H + 127) // 128) * 128

    if Hp != H:
        padw = Hp - H
        x_in = jnp.pad(x, ((0, 0), (0, 0), (0, padw)))
        gamma2d = jnp.pad(gamma.reshape(1, H), ((0, 0), (0, padw)))
        beta2d = jnp.pad(beta.reshape(1, H), ((0, 0), (0, padw)))
    else:
        x_in = x
        gamma2d = gamma.reshape(1, H)
        beta2d = beta.reshape(1, H)

    bb, th, est_block_vmem = _choose_tiles(B, S, Hp, xb, block_budget)
    # b innermost (fastest) => gamma/beta block index constant across steps.
    grid = (Hp // th, B // bb)

    vmem_limit = max(base_limit, min(est_block_vmem + 8 * _MB, int(cap * 0.98)))

    kernel = functools.partial(_layernorm_kernel, eps=float(eps), inv_s=1.0 / S)

    out = pl.pallas_call(
        kernel,
        out_shape=jax.ShapeDtypeStruct((B, S, Hp), x.dtype),
        grid_spec=pltpu.PrefetchScalarGridSpec(
            num_scalar_prefetch=0,
            grid=grid,
            in_specs=[
                pl.BlockSpec((bb, S, th), lambda h, b: (b, 0, h)),
                pl.BlockSpec((1, th), lambda h, b: (0, h)),
                pl.BlockSpec((1, th), lambda h, b: (0, h)),
            ],
            out_specs=pl.BlockSpec((bb, S, th), lambda h, b: (b, 0, h)),
        ),
        compiler_params=pltpu.CompilerParams(
            dimension_semantics=("parallel", "parallel"),
            vmem_limit_bytes=vmem_limit,
        ),
    )(x_in, gamma2d, beta2d)

    if Hp != H:
        out = out[..., :H]
    return out


# ----------------------------------------------------------------------------
# Reference + tests
# ----------------------------------------------------------------------------
def _reference(x, gamma, beta, eps=1e-5):
    # Pure-JAX mirror of the PyTorch forward (reduction over dim=-2).
    mean = jnp.mean(x, axis=-2, keepdims=True)
    var = jnp.mean((x - mean) ** 2, axis=-2, keepdims=True)
    y = (x - mean) / jnp.sqrt(var + eps)
    return gamma * y + beta


def _check(B, S, H, key, atol, offset=0.0, block_budget=None):
    kx, kg, kb = jax.random.split(key, 3)
    x = jax.random.normal(kx, (B, S, H), dtype=jnp.float32) + offset
    gamma = 1.0 + 0.1 * jax.random.normal(kg, (H,), dtype=jnp.float32)
    beta = 0.1 * jax.random.normal(kb, (H,), dtype=jnp.float32)

    out = layer_normalization(x, gamma, beta, eps=1e-5,
                              _block_budget_bytes=block_budget)
    out = jax.block_until_ready(out)

    ref = _reference(x, gamma, beta, eps=1e-5)
    assert out.shape == x.shape and out.dtype == x.dtype
    assert jnp.allclose(out, ref, atol=atol, rtol=1e-4), (
        f"mismatch vs reference at shape {(B, S, H)} offset={offset}"
    )


if __name__ == "__main__":
    key = jax.random.PRNGKey(0)
    k0, k1, k2, k3 = jax.random.split(key, 4)

    # Primary (small) shape consistent with the module: batch=2, seq=8, hidden=32.
    _check(B=2, S=8, H=32, key=k0, atol=2e-5)

    # Lane-aligned hidden-tiled path (H multiple of 128).
    _check(B=2, S=16, H=2048, key=k1, atol=2e-5)

    # Non-128-aligned H with a tiny forced VMEM budget: exercises the
    # pad-to-128 + multi-step (2x2 grid) path.
    _check(B=2, S=16, H=160, key=k2, atol=2e-5, block_budget=64 * 1024)

    # Non-centered data: two-pass variance must stay accurate.
    _check(B=2, S=8, H=32, key=k3, atol=1e-3, offset=100.0)

    print("KERNEL_OK")
</pallas_src>

<mosaic_0001>
module attributes {stable_mosaic.version = 11 : i64} {
  func.func @_layernorm_kernel(%arg0: i32, %arg1: i32, %arg2: memref<2x8x32xf32, #tpu.memory_space<vmem>>, %arg3: memref<1x32xf32, #tpu.memory_space<vmem>>, %arg4: memref<1x32xf32, #tpu.memory_space<vmem>>, %arg5: memref<2x8x32xf32, #tpu.memory_space<vmem>>) attributes {dimension_semantics = [#tpu.dimension_semantics<parallel>, #tpu.dimension_semantics<parallel>], iteration_bounds = array<i64: 1, 1>, scalar_prefetch = 0 : i64, scratch_operands = 0 : i64, tpu.core_type = #tpu.core_type<tc>, window_params = [{transform_indices = @transform_0, window_bounds = array<i64: 2, 8, 32>}, {transform_indices = @transform_1, window_bounds = array<i64: 1, 32>}, {transform_indices = @transform_2, window_bounds = array<i64: 1, 32>}, {transform_indices = @transform_3, window_bounds = array<i64: 2, 8, 32>}]} {
    %c0 = arith.constant 0 : index
    %c0_0 = arith.constant 0 : index
    %c0_1 = arith.constant 0 : index
    %0 = vector.load %arg2[%c0, %c0_0, %c0_1] : memref<2x8x32xf32, #tpu.memory_space<vmem>>, vector<2x8x32xf32>
    %cst = arith.constant dense<0.000000e+00> : vector<2x32xf32>
    %1 = vector.multi_reduction <add>, %0, %cst [1] : vector<2x8x32xf32> to vector<2x32xf32>
    %2 = vector.shape_cast %1 : vector<2x32xf32> to vector<2x1x32xf32>
    %cst_2 = arith.constant 1.250000e-01 : f32
    %3 = vector.broadcast %cst_2 : f32 to vector<2x1x32xf32>
    %4 = arith.mulf %2, %3 : vector<2x1x32xf32>
    %5 = vector.broadcast %4 : vector<2x1x32xf32> to vector<2x8x32xf32>
    %6 = arith.subf %0, %5 : vector<2x8x32xf32>
    %7 = arith.mulf %6, %6 : vector<2x8x32xf32>
    %cst_3 = arith.constant dense<0.000000e+00> : vector<2x32xf32>
    %8 = vector.multi_reduction <add>, %7, %cst_3 [1] : vector<2x8x32xf32> to vector<2x32xf32>
    %9 = vector.shape_cast %8 : vector<2x32xf32> to vector<2x1x32xf32>
    %cst_4 = arith.constant 1.250000e-01 : f32
    %10 = vector.broadcast %cst_4 : f32 to vector<2x1x32xf32>
    %11 = arith.mulf %9, %10 : vector<2x1x32xf32>
    %cst_5 = arith.constant 9.99999974E-6 : f32
    %12 = vector.broadcast %cst_5 : f32 to vector<2x1x32xf32>
    %13 = arith.addf %11, %12 : vector<2x1x32xf32>
    %14 = math.rsqrt %13 : vector<2x1x32xf32>
    %c0_6 = arith.constant 0 : index
    %c0_7 = arith.constant 0 : index
    %15 = vector.load %arg3[%c0_6, %c0_7] : memref<1x32xf32, #tpu.memory_space<vmem>>, vector<1x32xf32>
    %16 = vector.shape_cast %15 : vector<1x32xf32> to vector<1x1x32xf32>
    %c0_8 = arith.constant 0 : index
    %c0_9 = arith.constant 0 : index
    %17 = vector.load %arg4[%c0_8, %c0_9] : memref<1x32xf32, #tpu.memory_space<vmem>>, vector<1x32xf32>
    %18 = vector.shape_cast %17 : vector<1x32xf32> to vector<1x1x32xf32>
    %19 = vector.broadcast %16 : vector<1x1x32xf32> to vector<2x1x32xf32>
    %20 = arith.mulf %19, %14 : vector<2x1x32xf32>
    %21 = vector.broadcast %20 : vector<2x1x32xf32> to vector<2x8x32xf32>
    %22 = arith.mulf %6, %21 : vector<2x8x32xf32>
    %23 = vector.broadcast %18 : vector<1x1x32xf32> to vector<2x8x32xf32>
    %24 = arith.addf %22, %23 : vector<2x8x32xf32>
    %c0_10 = arith.constant 0 : index
    %c0_11 = arith.constant 0 : index
    %c0_12 = arith.constant 0 : index
    %25 = vector.load %arg5[%c0_10, %c0_11, %c0_12] : memref<2x8x32xf32, #tpu.memory_space<vmem>>, vector<2x8x32xf32>
    tpu.vector_store %arg5[%c0_10, %c0_11, %c0_12], %24 {strides = array<i32>} : memref<2x8x32xf32, #tpu.memory_space<vmem>>, vector<2x8x32xf32>,
    return
  }
  func.func @transform_0(%arg0: i32, %arg1: i32) -> (i32, i32, i32) {
    %c0_i32 = arith.constant 0 : i32
    %c0_i32_0 = arith.constant 0 : i32
    return %arg1, %c0_i32, %arg0 : i32, i32, i32
  }
  func.func @transform_1(%arg0: i32, %arg1: i32) -> (i32, i32) {
    %c0_i32 = arith.constant 0 : i32
    %c0_i32_0 = arith.constant 0 : i32
    return %c0_i32, %arg0 : i32, i32
  }
  func.func @transform_2(%arg0: i32, %arg1: i32) -> (i32, i32) {
    %c0_i32 = arith.constant 0 : i32
    %c0_i32_0 = arith.constant 0 : i32
    return %c0_i32, %arg0 : i32, i32
  }
  func.func @transform_3(%arg0: i32, %arg1: i32) -> (i32, i32, i32) {
    %c0_i32 = arith.constant 0 : i32
    %c0_i32_0 = arith.constant 0 : i32
    return %arg1, %c0_i32, %arg0 : i32, i32, i32
  }
}

</mosaic_0001>

<bundles_post_ra>
// kernel: tpu_custom_call.1
= control target key start
LH: loop header
LB: loop body
LE: loop exit
PB: predicated region body
PF: predicated region fallthrough
CT: control target
= control target key end

     0   :  { %8 = vsyncpa [#allocation3], 0  ;;  %s218_s0 = inlined_call_operand.hbm [shape: f32[2,8,32], index: 0, kind: input, shape index: {}]   ;;  %s219_s1 = inlined_call_operand.vmem [shape: f32[1,32], index: 1, kind: input, shape index: {}]   ;;  %s220_s2 = inlined_call_operand.vmem [shape: f32[1,32], index: 2, kind: input, shape index: {}]   ;;  %s221_s3 = inlined_call_operand.hbm [shape: f32[2,8,32], index: 3, kind: output, shape index: {}]  }
   0x1   :  { %9 = vsyncpa [#allocation4], 0  ;;  %s170_s12 = smov [#allocation2]  }
   0x2   :  { %s15_s13 = sshll.u32 %s170_s12, 4  ;;  %s16_s13 = int_to_ptr.vmem [resolvable:$true] %s15_s13 }
   0x3   :  { %s134_s14 = scalar_lea.vmem %s16_s13, 256  ;;  %p139_p1 = scmp.lt.s32.totalorder %s16_s13, %s16_s13 }
   0x4   :  { %p135_p0 = scmp.ne.s32.totalorder %s16_s13, %s134_s14  ;;  %p140_p2 = scmp.lt.s32.totalorder %s134_s14, %s134_s14 }
   0x6   :  { %p141_p3 = por %p140_p2, %p139_p1 }
   0x8   :  { %p142_p4 = pnand %p141_p3, %p135_p0 }
   0xa   :  { %145 = shalt.err (!%p142_p4)
}
   0xb   :  { %s171_s15 = smov 128   ;;  %s172_s16 = smov 8  }
   0xc   :  { %21 = dma.hbm_to_vmem [thread:$0]  %s218_s0, 256, %s16_s13, [#allocation3], %s171_s15, %s171_s15, %s172_s16  }
   0xd   :  { %166 = dma.done.wait [#allocation3], 256  }
   0xe   :  { %167 = vsyncadd [#allocation3], 4294967040  ;;  %vm31_vm0 = vcmask 261120   ;;  %v29_v0 = vld [vmem:[#allocation2] sm:$0xff]  ;;  %v30_v2 = vld [vmem:[#allocation2 + $0x8] sm:$0xff]  ;;  %v78_v40 = vlaneseq  ;;  %s173_s22 = smov [#allocation5]  }
   0xf   :  { %v32_v1 = vsel %vm31_vm0, %v29_v0, 0.0  ;;  %v39_v4 = vsel %vm31_vm0, %v30_v2, 0.0  ;;  %v72_v42 = vld [vmem:[%s219_s1] sm:$0x1]  ;;  %s105_s23 = sshll.u32 %s173_s22, 4  ;;  %s106_s23 = int_to_ptr.vmem [resolvable:$true] %s105_s23 }
  0x10   :  { %v33_v3 = vrot.slane %v32_v1, 4  ;;  %v40_v5 = vrot.slane %v39_v4, 4  ;;  %v79_v41 = vshrl.u32 %v78_v40, 7  ;;  %v117_v49 = vld [vmem:[%s220_s2] ss:$0 sm:$0xff]  ;;  %s146_s1 = scalar_lea.vmem %s106_s23, 256  ;;  %p151_p6 = scmp.lt.s32.totalorder %s106_s23, %s106_s23 }
  0x11   :  { %p147_p5 = scmp.ne.s32.totalorder %s106_s23, %s146_s1  ;;  %p152_p7 = scmp.lt.s32.totalorder %s146_s1, %s146_s1 }
  0x12   :  { %v34_v6 = vadd.f32 %v33_v3, %v32_v1  ;;  %v41_v7 = vadd.f32 %v40_v5, %v39_v4  ;;  %v80_v43 = vsub.s32 0, %v79_v41 }
  0x13   :  { %p153_p8 = por %p152_p7, %p151_p6 }
  0x14   :  { %v35_v8 = vrot.slane %v34_v6, 2  ;;  %v42_v9 = vrot.slane %v41_v7, 2 }
  0x15   :  { %p154_p9 = pnand %p153_p8, %p147_p5 }
  0x16   :  { %v36_v10 = vadd.f32 %v35_v8, %v34_v6  ;;  %v43_v11 = vadd.f32 %v42_v9, %v41_v7 }
  0x18   :  { %v37_v12 = vrot.slane %v36_v10, 1  ;;  %v44_v13 = vrot.slane %v43_v11, 1 }
  0x1a   :  { %v38_v14 = vadd.f32 %v37_v12, %v36_v10  ;;  %v45_v15 = vadd.f32 %v44_v13, %v43_v11 }
  0x1c   :  { %v46_v16 = vmul.f32 0.125, %v38_v14  ;;  %v47_v17 = vmul.f32 0.125, %v45_v15 }
  0x1e   :  { %v48_v18 = vsub.f32 %v29_v0, %v46_v16  ;;  %v49_v19 = vsub.f32 %v30_v2, %v47_v17 }
  0x20   :  { %v50_v20 = vmul.f32 %v48_v18, %v48_v18  ;;  %v51_v21 = vmul.f32 %v49_v19, %v49_v19 }
  0x22   :  { %v52_v22 = vsel %vm31_vm0, %v50_v20, 0.0  ;;  %v59_v24 = vsel %vm31_vm0, %v51_v21, 0.0 }
  0x23   :  { %v53_v23 = vrot.slane %v52_v22, 4  ;;  %v60_v25 = vrot.slane %v59_v24, 4 }
  0x25   :  { %v54_v26 = vadd.f32 %v53_v23, %v52_v22  ;;  %v61_v27 = vadd.f32 %v60_v25, %v59_v24 }
  0x27   :  { %v55_v28 = vrot.slane %v54_v26, 2  ;;  %v62_v29 = vrot.slane %v61_v27, 2 }
  0x29   :  { %v56_v30 = vadd.f32 %v55_v28, %v54_v26  ;;  %v63_v31 = vadd.f32 %v62_v29, %v61_v27 }
  0x2b   :  { %v57_v32 = vrot.slane %v56_v30, 1  ;;  %v64_v33 = vrot.slane %v63_v31, 1 }
  0x2d   :  { %v58_v34 = vadd.f32 %v57_v32, %v56_v30  ;;  %v65_v35 = vadd.f32 %v64_v33, %v63_v31 }
  0x2f   :  { %v66_v36 = vmul.f32 0.125, %v58_v34  ;;  %v67_v37 = vmul.f32 0.125, %v65_v35 }
  0x31   :  { %v68_v38 = vadd.f32 1e-05, %v66_v36  ;;  %v69_v39 = vadd.f32 1e-05, %v67_v37 }
  0x33   :  { %122 = vrsqrt.f32 %v68_v38 }
  0x34   :  { %124 = vrsqrt.f32 %v69_v39 }
  0x40   :  { %v123_v44 = vpop.eup %122 }
  0x41   :  { %v125_v45 = vpop.eup %124  ;;  %v74_v46 = vmul.f32 %v123_v44, %v72_v42 }
  0x42   :  { %v75_v47 = vmul.f32 %v125_v45, %v72_v42 }
  0x43   :  { %v81_v48 = vrot.slane %v74_v46, %v80_v43 }
  0x44   :  { %v85_v50 = vrot.slane %v75_v47, %v80_v43 }
  0x45   :  { %v88_v51 = vmul.f32 %v81_v48, %v48_v18 }
  0x46   :  { %v89_v52 = vmul.f32 %v85_v50, %v49_v19 }
  0x47   :  { %v96_v53 = vadd.f32 %v117_v49, %v88_v51 }
  0x48   :  { %v97_v54 = vadd.f32 %v117_v49, %v89_v52 }
  0x49   :  { %98 = vst.msk [vmem:[#allocation5] sm:$0xff] %vm31_vm0, %v96_v53 }
  0x4a   :  { %99 = vst.msk [vmem:[#allocation5 + $0x8] sm:$0xff] %vm31_vm0, %v97_v54 }
  0x4b   :  { %157 = shalt.err (!%p154_p9)
}
  0x4c   :  { %111 = dma.vmem_to_hbm [thread:$0]  %s106_s23, 256, %s221_s3, [#allocation4], %s171_s15, %s171_s15, %s172_s16  }
  0x4d   :  { %168 = dma.done.wait [#allocation4], 256  }
  0x4e   :  { %169 = vsyncadd [#allocation4], 4294967040 }
  0x4f   :  { %115 = vsyncpa [#allocation3], 1 }
  0x50   :  { %116 = vsyncpa [#allocation4], 1 }

</bundles_post_ra>
